<compile_context>
chip_gen: v5e
topology: v5e:2x2
jax: 0.10.0
libtpu: 0.0.40
codegen_flags: <defaults>
</compile_context>

<pallas_src>
import jax
import jax.numpy as jnp
import numpy as np
from jax.experimental import pallas as pl
from jax.experimental.pallas import tpu as pltpu

LANE = 128


def _round_up(v, m):
    return ((v + m - 1) // m) * m


# ---------------- kernels ----------------

def gin1_kernel(adj_ref, x_ref, w1a_ref, b1a_ref, w1b_ref, b1b_ref, h_ref, acc_ref):
    """GIN layer 1 (+ trailing ReLU) for one (row-tile i, contraction-tile k) grid step."""
    k = pl.program_id(1)

    @pl.when(k == 0)
    def _():
        acc_ref[...] = jnp.zeros_like(acc_ref)

    # Adjacency streamed as bf16 (small exact integer counts); upcasting before the dot keeps
    # the aggregation bit-identical to f32 while halving its HBM / VMEM footprint.
    acc_ref[...] += jnp.dot(adj_ref[...].astype(jnp.float32), x_ref[...],
                            preferred_element_type=jnp.float32)

    @pl.when(k == pl.num_programs(1) - 1)
    def _():
        agg = acc_ref[...]        # (1+eps)*x + neighbor-sum (self loops folded into A)
        h = jnp.maximum(
            jnp.dot(agg, w1a_ref[...], preferred_element_type=jnp.float32) + b1a_ref[...], 0.0)
        h = jnp.maximum(
            jnp.dot(h, w1b_ref[...], preferred_element_type=jnp.float32) + b1b_ref[...], 0.0)
        h_ref[...] = h            # relu(conv1(x)) for this row tile


def gin2_head_kernel(adj_ref, h_ref, w2a_ref, b2a_ref, w2b_ref, b2b_ref,
                     w3_ref, b3_ref, w4_ref, b4_ref, out_ref, acc_ref):
    """GIN layer 2 + ReLU + Linear1 + ReLU + Linear2 for one (i, k) grid step."""
    k = pl.program_id(1)

    @pl.when(k == 0)
    def _():
        acc_ref[...] = jnp.zeros_like(acc_ref)

    acc_ref[...] += jnp.dot(adj_ref[...].astype(jnp.float32), h_ref[...],
                            preferred_element_type=jnp.float32)

    @pl.when(k == pl.num_programs(1) - 1)
    def _():
        agg = acc_ref[...]
        h = jnp.maximum(
            jnp.dot(agg, w2a_ref[...], preferred_element_type=jnp.float32) + b2a_ref[...], 0.0)
        h = jnp.maximum(
            jnp.dot(h, w2b_ref[...], preferred_element_type=jnp.float32) + b2b_ref[...], 0.0)
        h = jnp.maximum(
            jnp.dot(h, w3_ref[...], preferred_element_type=jnp.float32) + b3_ref[...], 0.0)
        out_ref[...] = jnp.dot(h, w4_ref[...], preferred_element_type=jnp.float32) + b4_ref[...]


# ---------------- wrapper ----------------

def _tpu_vmem_capacity_bytes():
    try:
        return int(pltpu.get_tpu_info().vmem_capacity_bytes)
    except Exception:
        return 128 << 20          # conservative fallback (v5e/v6e-class)


def _choose_tiling(n, tile_n, tile_k):
    """Pick row tile tn (multiple of 8), contraction tile tk, and padded node count n_pad."""
    n8 = _round_up(max(n, 8), 8)
    if n8 <= tile_n:
        # Small graph: keep >= 2 row tiles so the "parallel" axis can feed both v7x TCs.
        tn = max(8, _round_up(-(-n8 // 2), 8))
        n_pad = max(_round_up(n8, tn), 2 * tn)
    else:
        tn = tile_n
        n_pad = _round_up(n8, tn)
    if n_pad <= tile_k:
        tk = n_pad                # single K step; lane dim == full array dim is a legal block
    else:
        tk = tile_k               # multiple of 128 (and of tn), bounds VMEM at O(tn*tk)
        n_pad = _round_up(n_pad, tk)
    return n_pad, tn, tk


def mlp_graph_model_forward(x, edge_index, params, *, tile_n=None, tile_k=None):
    """x: [N, input_dim] f32, edge_index: [2, E] int (row 0 = src, row 1 = dst)."""
    n, in_dim = x.shape
    half = params["w1a"].shape[1]
    hidden = params["w1b"].shape[1]
    out_dim = params["w4"].shape[1]

    vmem_cap = _tpu_vmem_capacity_bytes()
    small_vmem = vmem_cap <= (64 << 20)            # v7x-class TensorCore
    if tile_n is None:
        tile_n = 256 if small_vmem else 512
    if tile_k is None:
        tile_k = 512 if small_vmem else 1024
    tile_k = _round_up(max(tile_k, tile_n), tile_n)   # tn | tk keeps divisibility simple
    vmem_budget = (vmem_cap - (8 << 20)) if small_vmem else (100 << 20)

    # Lane-dense padded feature dims (unmasked vst on every output column block).
    f_in = _round_up(in_dim, LANE)
    f_half = _round_up(half, LANE)
    f_hid = _round_up(hidden, LANE)
    f_out = _round_up(out_dim, LANE)

    n_pad, tn, tk = _choose_tiling(n, tile_n, tile_k)
    grid = (n_pad // tn, n_pad // tk)

    # Dense adjacency with self-loops folded in, built by ONE scatter directly in bf16:
    # (A + I) @ X == X + neighbor-sum. Edge counts are small integers -> exact in bf16.
    ei = edge_index.astype(jnp.int32)
    diag = jnp.arange(n, dtype=jnp.int32)
    rows = jnp.concatenate([ei[1], diag])
    cols = jnp.concatenate([ei[0], diag])
    adj = jnp.zeros((n_pad, n_pad), jnp.bfloat16).at[rows, cols].add(1.0)

    def pad_to(a, r, c):
        a = a.astype(jnp.float32)
        return jnp.zeros((r, c), jnp.float32).at[:a.shape[0], :a.shape[1]].set(a)

    x_p = pad_to(x, n_pad, f_in)
    w1a = pad_to(params["w1a"], f_in, f_half);   b1a = pad_to(params["b1a"], 1, f_half)
    w1b = pad_to(params["w1b"], f_half, f_hid);  b1b = pad_to(params["b1b"], 1, f_hid)
    w2a = pad_to(params["w2a"], f_hid, f_hid);   b2a = pad_to(params["b2a"], 1, f_hid)
    w2b = pad_to(params["w2b"], f_hid, f_hid);   b2b = pad_to(params["b2b"], 1, f_hid)
    w3 = pad_to(params["w3"], f_hid, f_hid);     b3 = pad_to(params["b3"], 1, f_hid)
    w4 = pad_to(params["w4"], f_hid, f_out);     b4 = pad_to(params["b4"], 1, f_out)

    # Streamed adjacency (row x contraction) tile.
    # TODO(synk): sweep pipeline_mode=pl.Buffered(3) here once the pipeline is DMA-exposed.
    adj_spec = pl.BlockSpec((tn, tk), lambda i, k: (i, k))

    def feat_spec(c):                                   # streamed contraction tile of features
        return pl.BlockSpec((tk, c), lambda i, k: (k, 0))

    def out_spec(c):                                    # resident across K (accumulator output)
        return pl.BlockSpec((tn, c), lambda i, k: (i, 0))

    def const_spec(r, c):                               # weights / biases, constant block index
        # TODO(synk): pipeline_mode=pl.Buffered(1) would single-buffer these constant blocks;
        # footprint is <1 MiB here so defaults are kept for compile robustness.
        return pl.BlockSpec((r, c), lambda i, k: (0, 0))

    def make_params(vmem_est):
        if vmem_est > vmem_budget:
            raise ValueError(f"VMEM estimate {vmem_est} exceeds budget {vmem_budget}; "
                             f"reduce tile_n/tile_k.")
        return pltpu.CompilerParams(
            dimension_semantics=("parallel", "arbitrary"),
            vmem_limit_bytes=int(min(max(vmem_est, 16 << 20), vmem_budget)))

    headroom = 2 << 20

    # ---- call 1: GIN layer 1 (+ its trailing relu) ----
    est1 = (2 * tn * tk * 2                                              # adj tiles (bf16), x2
            + 2 * tk * f_in * 4                                          # x tiles, x2
            + 2 * 4 * (f_in * f_half + f_half * f_hid + f_half + f_hid)  # weights+biases, x2
            + 2 * tn * f_hid * 4                                         # output tiles, x2
            + tn * f_in * 4                                              # accumulator scratch
            + headroom)
    flops1 = 2 * n_pad * (n_pad * f_in + f_in * f_half + f_half * f_hid)
    bytes1 = (2 * n_pad * n_pad + 4 * n_pad * f_in * (n_pad // tn) + 4 * n_pad * f_hid
              + 4 * (f_in * f_half + f_half * f_hid + f_half + f_hid))

    h1 = pl.pallas_call(
        gin1_kernel,
        grid=grid,
        in_specs=[adj_spec, feat_spec(f_in),
                  const_spec(f_in, f_half), const_spec(1, f_half),
                  const_spec(f_half, f_hid), const_spec(1, f_hid)],
        out_specs=out_spec(f_hid),
        out_shape=jax.ShapeDtypeStruct((n_pad, f_hid), jnp.float32),
        scratch_shapes=[pltpu.VMEM((tn, f_in), jnp.float32)],
        compiler_params=make_params(est1),
        cost_estimate=pl.CostEstimate(flops=int(flops1), transcendentals=0,
                                      bytes_accessed=int(bytes1)),
    )(adj, x_p, w1a, b1a, w1b, b1b)

    # ---- call 2: GIN layer 2 + ReLU + Linear1 + ReLU + Linear2 ----
    est2 = (2 * tn * tk * 2
            + 2 * tk * f_hid * 4
            + 2 * 4 * (3 * f_hid * f_hid + f_hid * f_out + 3 * f_hid + f_out)
            + 2 * tn * f_out * 4
            + tn * f_hid * 4
            + headroom)
    flops2 = 2 * n_pad * (n_pad * f_hid + 3 * f_hid * f_hid + f_hid * f_out)
    bytes2 = (2 * n_pad * n_pad + 4 * n_pad * f_hid * (n_pad // tn) + 4 * n_pad * f_out
              + 4 * (3 * f_hid * f_hid + f_hid * f_out + 3 * f_hid + f_out))

    out_pad = pl.pallas_call(
        gin2_head_kernel,
        grid=grid,
        in_specs=[adj_spec, feat_spec(f_hid),
                  const_spec(f_hid, f_hid), const_spec(1, f_hid),
                  const_spec(f_hid, f_hid), const_spec(1, f_hid),
                  const_spec(f_hid, f_hid), const_spec(1, f_hid),
                  const_spec(f_hid, f_out), const_spec(1, f_out)],
        out_specs=out_spec(f_out),
        out_shape=jax.ShapeDtypeStruct((n_pad, f_out), jnp.float32),
        scratch_shapes=[pltpu.VMEM((tn, f_hid), jnp.float32)],
        compiler_params=make_params(est2),
        cost_estimate=pl.CostEstimate(flops=int(flops2), transcendentals=0,
                                      bytes_accessed=int(bytes2)),
    )(adj, h1, w2a, b2a, w2b, b2b, w3, b3, w4, b4)

    return out_pad[:n, :out_dim]


# ---------------- params / reference ----------------

def init_params(key, input_dim, hidden_dim, output_dim):
    """Deterministic parameter init. Weights stored as [in, out] (x @ W + b)."""
    half = hidden_dim // 2
    shapes = {
        "w1a": (input_dim, half),        "b1a": (1, half),
        "w1b": (half, hidden_dim),       "b1b": (1, hidden_dim),
        "w2a": (hidden_dim, hidden_dim), "b2a": (1, hidden_dim),
        "w2b": (hidden_dim, hidden_dim), "b2b": (1, hidden_dim),
        "w3":  (hidden_dim, hidden_dim), "b3":  (1, hidden_dim),
        "w4":  (hidden_dim, output_dim), "b4":  (1, output_dim),
    }
    params = {}
    keys = jax.random.split(key, len(shapes))
    for k, (name, shape) in zip(keys, shapes.items()):
        params[name] = (0.1 * jax.random.normal(k, shape)).astype(jnp.float32)
    return params


def reference_forward(x, edge_index, params):
    n = x.shape[0]
    adj = jnp.zeros((n, n), jnp.float32).at[edge_index[1], edge_index[0]].add(1.0)
    h = x + adj @ x
    h = jnp.maximum(h @ params["w1a"] + params["b1a"], 0.0)
    h = jnp.maximum(h @ params["w1b"] + params["b1b"], 0.0)
    h = h + adj @ h
    h = jnp.maximum(h @ params["w2a"] + params["b2a"], 0.0)
    h = jnp.maximum(h @ params["w2b"] + params["b2b"], 0.0)
    h = jnp.maximum(h @ params["w3"] + params["b3"], 0.0)
    return h @ params["w4"] + params["b4"]


if __name__ == "__main__":
    N, INPUT_DIM, HIDDEN_DIM, OUTPUT_DIM = 8, 16, 32, 8

    root = jax.random.PRNGKey(0)
    k_x, k_p = jax.random.split(root)

    x = jax.random.normal(k_x, (N, INPUT_DIM), dtype=jnp.float32)

    # Small deterministic graph: bidirectional ring over N nodes -> edge_index [2, 2N]
    src = jnp.concatenate([jnp.arange(N), (jnp.arange(N) + 1) % N]).astype(jnp.int32)
    dst = jnp.concatenate([(jnp.arange(N) + 1) % N, jnp.arange(N)]).astype(jnp.int32)
    edge_index = jnp.stack([src, dst], axis=0)   # [2, 16]

    params = init_params(k_p, INPUT_DIM, HIDDEN_DIM, OUTPUT_DIM)

    out = mlp_graph_model_forward(x, edge_index, params)
    jax.block_until_ready(out)
    assert out.shape == (N, OUTPUT_DIM)

    ref = reference_forward(x, edge_index, params)
    np.testing.assert_allclose(np.asarray(out), np.asarray(ref), rtol=1e-4, atol=1e-4)

    print("KERNEL_OK")
</pallas_src>

<mosaic_0001>
module attributes {stable_mosaic.version = 11 : i64} {
  func.func @gin1_kernel(%arg0: i32, %arg1: i32, %arg2: memref<8x16xbf16, #tpu.memory_space<vmem>>, %arg3: memref<16x128xf32, #tpu.memory_space<vmem>>, %arg4: memref<128x128xf32, #tpu.memory_space<vmem>>, %arg5: memref<1x128xf32, #tpu.memory_space<vmem>>, %arg6: memref<128x128xf32, #tpu.memory_space<vmem>>, %arg7: memref<1x128xf32, #tpu.memory_space<vmem>>, %arg8: memref<8x128xf32, #tpu.memory_space<vmem>>, %arg9: memref<8x128xf32, #tpu.memory_space<vmem>>) attributes {dimension_semantics = [#tpu.dimension_semantics<parallel>, #tpu.dimension_semantics<arbitrary>], iteration_bounds = array<i64: 2, 1>, scalar_prefetch = 0 : i64, scratch_operands = 1 : i64, tpu.core_type = #tpu.core_type<tc>, window_params = [{transform_indices = @transform_0, window_bounds = array<i64: 8, 16>}, {transform_indices = @transform_1, window_bounds = array<i64: 16, 128>}, {pipeline_mode = #tpu.pipeline_mode<synchronous>, transform_indices = @transform_2, window_bounds = array<i64: 128, 128>}, {pipeline_mode = #tpu.pipeline_mode<synchronous>, transform_indices = @transform_3, window_bounds = array<i64: 1, 128>}, {pipeline_mode = #tpu.pipeline_mode<synchronous>, transform_indices = @transform_4, window_bounds = array<i64: 128, 128>}, {pipeline_mode = #tpu.pipeline_mode<synchronous>, transform_indices = @transform_5, window_bounds = array<i64: 1, 128>}, {transform_indices = @transform_6, window_bounds = array<i64: 8, 128>}]} {
    %c0_i32 = arith.constant 0 : i32
    %0 = arith.cmpi eq, %arg1, %c0_i32 : i32
    %1 = arith.extui %0 : i1 to i32
    %c0_i32_0 = arith.constant 0 : i32
    %2 = arith.cmpi ne, %1, %c0_i32_0 : i32
    scf.if %2 {
      %cst_10 = arith.constant 0.000000e+00 : f32
      %13 = vector.broadcast %cst_10 : f32 to vector<8x128xf32>
      %c0_11 = arith.constant 0 : index
      %c0_12 = arith.constant 0 : index
      %14 = vector.load %arg9[%c0_11, %c0_12] : memref<8x128xf32, #tpu.memory_space<vmem>>, vector<8x128xf32>
      tpu.vector_store %arg9[%c0_11, %c0_12], %13 {strides = array<i32>} : memref<8x128xf32, #tpu.memory_space<vmem>>, vector<8x128xf32>,
    } else {
    }
    %c0 = arith.constant 0 : index
    %c0_1 = arith.constant 0 : index
    %3 = vector.load %arg9[%c0, %c0_1] : memref<8x128xf32, #tpu.memory_space<vmem>>, vector<8x128xf32>
    %c0_2 = arith.constant 0 : index
    %c0_3 = arith.constant 0 : index
    %4 = vector.load %arg2[%c0_2, %c0_3] : memref<8x16xbf16, #tpu.memory_space<vmem>>, vector<8x16xbf16>
    %5 = arith.extf %4 : vector<8x16xbf16> to vector<8x16xf32>
    %c0_4 = arith.constant 0 : index
    %c0_5 = arith.constant 0 : index
    %6 = vector.load %arg3[%c0_4, %c0_5] : memref<16x128xf32, #tpu.memory_space<vmem>>, vector<16x128xf32>
    %cst = arith.constant dense<0.000000e+00> : vector<8x128xf32>
    %7 = tpu.matmul %5, %6, %cst {dimension_numbers = #tpu.dot_dimension_numbers<[1], [0], [0], [1], [0, 0, 1, 1], [], []>} : vector<8x16xf32>, vector<16x128xf32>, vector<8x128xf32> -> vector<8x128xf32>
    %8 = arith.addf %3, %7 : vector<8x128xf32>
    %c0_6 = arith.constant 0 : index
    %c0_7 = arith.constant 0 : index
    %9 = vector.load %arg9[%c0_6, %c0_7] : memref<8x128xf32, #tpu.memory_space<vmem>>, vector<8x128xf32>
    tpu.vector_store %arg9[%c0_6, %c0_7], %8 {strides = array<i32>} : memref<8x128xf32, #tpu.memory_space<vmem>>, vector<8x128xf32>,
    %c0_i32_8 = arith.constant 0 : i32
    %10 = arith.cmpi eq, %arg1, %c0_i32_8 : i32
    %11 = arith.extui %10 : i1 to i32
    %c0_i32_9 = arith.constant 0 : i32
    %12 = arith.cmpi ne, %11, %c0_i32_9 : i32
    scf.if %12 {
      %c0_10 = arith.constant 0 : index
      %c0_11 = arith.constant 0 : index
      %13 = vector.load %arg9[%c0_10, %c0_11] : memref<8x128xf32, #tpu.memory_space<vmem>>, vector<8x128xf32>
      %c0_12 = arith.constant 0 : index
      %c0_13 = arith.constant 0 : index
      %14 = vector.load %arg4[%c0_12, %c0_13] : memref<128x128xf32, #tpu.memory_space<vmem>>, vector<128x128xf32>
      %cst_14 = arith.constant dense<0.000000e+00> : vector<8x128xf32>
      %15 = tpu.matmul %13, %14, %cst_14 {dimension_numbers = #tpu.dot_dimension_numbers<[1], [0], [0], [1], [0, 0, 1, 1], [], []>} : vector<8x128xf32>, vector<128x128xf32>, vector<8x128xf32> -> vector<8x128xf32>
      %c0_15 = arith.constant 0 : index
      %c0_16 = arith.constant 0 : index
      %16 = vector.load %arg5[%c0_15, %c0_16] : memref<1x128xf32, #tpu.memory_space<vmem>>, vector<1x128xf32>
      %17 = vector.broadcast %16 : vector<1x128xf32> to vector<8x128xf32>
      %18 = arith.addf %15, %17 : vector<8x128xf32>
      %cst_17 = arith.constant 0.000000e+00 : f32
      %19 = vector.broadcast %cst_17 : f32 to vector<8x128xf32>
      %20 = arith.maximumf %18, %19 : vector<8x128xf32>
      %c0_18 = arith.constant 0 : index
      %c0_19 = arith.constant 0 : index
      %21 = vector.load %arg6[%c0_18, %c0_19] : memref<128x128xf32, #tpu.memory_space<vmem>>, vector<128x128xf32>
      %cst_20 = arith.constant dense<0.000000e+00> : vector<8x128xf32>
      %22 = tpu.matmul %20, %21, %cst_20 {dimension_numbers = #tpu.dot_dimension_numbers<[1], [0], [0], [1], [0, 0, 1, 1], [], []>} : vector<8x128xf32>, vector<128x128xf32>, vector<8x128xf32> -> vector<8x128xf32>
      %c0_21 = arith.constant 0 : index
      %c0_22 = arith.constant 0 : index
      %23 = vector.load %arg7[%c0_21, %c0_22] : memref<1x128xf32, #tpu.memory_space<vmem>>, vector<1x128xf32>
      %24 = vector.broadcast %23 : vector<1x128xf32> to vector<8x128xf32>
      %25 = arith.addf %22, %24 : vector<8x128xf32>
      %cst_23 = arith.constant 0.000000e+00 : f32
      %26 = vector.broadcast %cst_23 : f32 to vector<8x128xf32>
      %27 = arith.maximumf %25, %26 : vector<8x128xf32>
      %c0_24 = arith.constant 0 : index
      %c0_25 = arith.constant 0 : index
      %28 = vector.load %arg8[%c0_24, %c0_25] : memref<8x128xf32, #tpu.memory_space<vmem>>, vector<8x128xf32>
      tpu.vector_store %arg8[%c0_24, %c0_25], %27 {strides = array<i32>} : memref<8x128xf32, #tpu.memory_space<vmem>>, vector<8x128xf32>,
    } else {
    }
    return
  }
  func.func @transform_0(%arg0: i32, %arg1: i32) -> (i32, i32) {
    %c0_i32 = arith.constant 0 : i32
    return %arg0, %arg1 : i32, i32
  }
  func.func @transform_1(%arg0: i32, %arg1: i32) -> (i32, i32) {
    %c0_i32 = arith.constant 0 : i32
    %c0_i32_0 = arith.constant 0 : i32
    return %arg1, %c0_i32 : i32, i32
  }
  func.func @transform_2(%arg0: i32, %arg1: i32) -> (i32, i32) {
    %c0_i32 = arith.constant 0 : i32
    %c0_i32_0 = arith.constant 0 : i32
    %c0_i32_1 = arith.constant 0 : i32
    return %c0_i32, %c0_i32_0 : i32, i32
  }
  func.func @transform_3(%arg0: i32, %arg1: i32) -> (i32, i32) {
    %c0_i32 = arith.constant 0 : i32
    %c0_i32_0 = arith.constant 0 : i32
    %c0_i32_1 = arith.constant 0 : i32
    return %c0_i32, %c0_i32_0 : i32, i32
  }
  func.func @transform_4(%arg0: i32, %arg1: i32) -> (i32, i32) {
    %c0_i32 = arith.constant 0 : i32
    %c0_i32_0 = arith.constant 0 : i32
    %c0_i32_1 = arith.constant 0 : i32
    return %c0_i32, %c0_i32_0 : i32, i32
  }
  func.func @transform_5(%arg0: i32, %arg1: i32) -> (i32, i32) {
    %c0_i32 = arith.constant 0 : i32
    %c0_i32_0 = arith.constant 0 : i32
    %c0_i32_1 = arith.constant 0 : i32
    return %c0_i32, %c0_i32_0 : i32, i32
  }
  func.func @transform_6(%arg0: i32, %arg1: i32) -> (i32, i32) {
    %c0_i32 = arith.constant 0 : i32
    %c0_i32_0 = arith.constant 0 : i32
    return %arg0, %c0_i32 : i32, i32
  }
}

</mosaic_0001>

<bundles_post_ra>
// kernel: tpu_custom_call.1
= control target key start
LH: loop header
LB: loop body
LE: loop exit
PB: predicated region body
PF: predicated region fallthrough
CT: control target
= control target key end

     0   :  { %s1135_s0 = inlined_call_operand.hbm [shape: bf16[16,16], index: 0, kind: input, shape index: {}]   ;;  %s1136_s1 = inlined_call_operand.hbm [shape: f32[16,128], index: 1, kind: input, shape index: {}]   ;;  %s1137_s2 = inlined_call_operand.hbm [shape: f32[128,128], index: 2, kind: input, shape index: {}]   ;;  %s1138_s3 = inlined_call_operand.vmem [shape: f32[1,128], index: 3, kind: input, shape index: {}]   ;;  %s1139_s4 = inlined_call_operand.hbm [shape: f32[128,128], index: 4, kind: input, shape index: {}]   ;;  %s1140_s5 = inlined_call_operand.vmem [shape: f32[1,128], index: 5, kind: input, shape index: {}]   ;;  %s1141_s6 = inlined_call_operand.hbm [shape: f32[16,128], index: 6, kind: output, shape index: {}]  }
   0x1   :  { %1142 = sst [smem:[#allocation16_spill]] %s1136_s1 }
   0x2   :  { %11 = vsyncpa [#allocation4], 0 }
   0x3   :  { %13 = vsyncpa [#allocation4 + $0x1], 0 }
   0x4   :  { %14 = vsyncpa [#allocation7], 0 }
   0x5   :  { %15 = vsyncpa [#allocation10], 0 }
   0x6   :  { %16 = vsyncpa [#allocation5], 0 }
   0x7   :  { %18 = vsyncpa [#allocation5 + $0x1], 0  ;;  %s961_s21 = smov 0   ;;  %s963_s22 = smov 0  }
   0x8   :  { %s965_s23 = smov 0   ;;  %s967_s24 = smov 0  }
   0x9   :  { %s969_s25 = smov 0   ;;  %s971_s26 = smov 0  }
   0xa LB: > { %s592_s27 = sadd.s32 4294967295, %s919_s26   ;;  %p594_p0 = scmp.ge.s32.totalorder %s919_s26, 1  ;;  %s919_s26 = sphi %s971_s26, %s24_s26   ;;  %s915_s25 = sphi %s969_s25, %s1155_s25   ;;  %s911_s24 = sphi %s967_s24, %s1154_s24   ;;  %s907_s23 = sphi %s965_s23, %s1153_s23   ;;  %s903_s22 = sphi %s963_s22, %s1152_s22   ;;  %s899_s21 = sphi %s961_s21, %s1151_s21  }
   0xb   : > { %p995_p1 = scmp.eq.s32.totalorder %s592_s27, 0  ;;  %p205_p2 = scmp.lt.s32.totalorder %s919_s26, 3 }
   0xc   : > { %s1144_s1 = sld [smem:[#allocation16_spill]]  ;;  %s921_s9 = smov [#allocation6]  }
   0xd   : > { %p1003_p3 = pnand %p594_p0, %p205_p2  ;;  %s221_s10 = sshll.u32 %s921_s9, 4  ;;  %s222_s10 = int_to_ptr.vmem [resolvable:$true] %s221_s10 }
   0xe   : > { %p598_p6 = scmp.ge.s32.totalorder %s919_s26, 2  ;;  %s233_s14 = sshll.u32 %s1137_s2, 4  ;;  %s234_s14 = int_to_ptr.hbm [resolvable:$true] %s233_s14 }
   0xf   : > { %p628_p4 = pneg %p1003_p3  ;;  %s922_s15 = smov 128  }
  0x10   : > { %s923_s16 = smov 8   ;;  %s924_s17 = smov [#allocation8]  }
  0x11   : > { %p1011_p5 = pnand %p628_p4, %p995_p1  ;;  %s235_s18 = sshll.u32 %s924_s17, 4  ;;  %s236_s18 = int_to_ptr.vmem [resolvable:$true] %s235_s18 }
  0x12   : > { %s219_s7 = sshll.u32 %s1144_s1, 4  ;;  %s250_s29 = sshll.u32 %s1139_s4, 4  ;;  %s220_s7 = int_to_ptr.hbm [resolvable:$true] %s219_s7  ;;  %s251_s29 = int_to_ptr.hbm [resolvable:$true] %s250_s29 }
  0x13   : > { %631 = dma.hbm_to_vmem [thread:$0]  (!%p1011_p5), %s220_s7, 256, %s222_s10, [#allocation7], %s922_s15, %s922_s15, %s923_s16  }
  0x14   : > { %634 = dma.hbm_to_vmem [thread:$0]  (!%p1011_p5), %s234_s14, 2048, %s236_s18, [#allocation7], %s922_s15, %s922_s15, %s923_s16  }
  0x15   : > { %s925_s30 = smov [#allocation9]   ;;  %s593_s7 = sadd.s32 4294967294, %s919_s26  }
  0x16   : > { %s252_s9 = sshll.u32 %s925_s30, 4  ;;  %s36_s10 = sadd.s32 1, %s915_s25  ;;  %s253_s9 = int_to_ptr.vmem [resolvable:$true] %s252_s9 }
  0x17   : > { %637 = dma.hbm_to_vmem [thread:$0]  (!%p1011_p5), %s251_s29, 2048, %s253_s9, [#allocation10], %s922_s15, %s922_s15, %s923_s16  }
  0x18   : > { %s45_s12 = sadd.s32 1, %s907_s23  ;;  %p38_p7 = scmp.ge.s32.totalorder %s36_s10, 2 }
  0x19   : > { %p52_p8 = scmp.ne.s32.totalorder %s907_s23, %s903_s22  ;;  %p53_p9 = scmp.eq.s32.totalorder %s919_s26, 0 }
  0x1a   : > { %p58_p10 = scmp.ne.s32.totalorder %s903_s22, %s899_s21  ;;  %s1157_s10 = smov (%p38_p7, %s36_s10), 0 }
  0x1b   : > { %p1038_p11 = por %p53_p9, %p52_p8  ;;  %s40_s14 = ssub.s32 %s915_s25, %s1157_s10 }
  0x1c   : > { %p1044_p12 = por %p995_p1, %p58_p10  ;;  %p192_p13 = scmp.eq.s32.totalorder %s592_s27, 1 }
  0x1d   : > { %p43_p0 = scmp.eq.s32.totalorder %s40_s14, 0  ;;  %p198_p2 = scmp.eq.s32.totalorder %s593_s7, 1 }
  0x1e   : > { %p1052_p4 = por %p192_p13, %p52_p8  ;;  %p649_p5 = scmp.lt.s32.totalorder %s919_s26, 2 }
  0x1f   : > { %s1058_s16 = scalar_select %p43_p0, %s907_s23, %s45_s12  }
  0x20   : > { %p1060_p7 = por %p198_p2, %p58_p10  ;;  %s269_s18 = sand.u32 1, %s907_s23  }
  0x21   : > { %s599_s19 = sshll.u32 %s269_s18, 2  ;;  %s600_s20 = sshll.u32 %s915_s25, 2 }
  0x22   : > { %s278_s27 = scalar_lea.hbm %s1135_s0, %s600_s20  ;;  %s273_s9 = scalar_lea.vmem [#allocation3], %s599_s19 }
  0x23   : > { %s282_s7 = sshll.u32 %s273_s9, 4  ;;  %s280_s14 = sshll.u32 %s278_s27, 4  ;;  %s283_s7 = int_to_ptr.vmem [resolvable:$true] %s282_s7  ;;  %s281_s14 = int_to_ptr.hbm [resolvable:$true] %s280_s14 }
  0x24   : > { %p639_p8 = pnand %p649_p5, %p1038_p11  ;;  %s270_s12 = scalar_lea.sflag [#allocation4], %s269_s18 }
  0x25   : > { %291 = sbr.rel (%p1003_p3) target bundleno = 446 (0x1be), region = 44  ;;  %s1074_s1 = sand.u32 (!%p1003_p3), 1, %s903_s22  }
  0x26   : > { %641 = dma.hbm_to_vmem [thread:$0]  (!%p639_p8), %s281_s14, 64, %s283_s7, %s270_s12  }
  0x27   : > { %s602_s29 = sshll.u32 (!%p1003_p3), %s1074_s1, 2  ;;  %s294_s20 = scalar_lea.sflag (!%p1003_p3), [#allocation4], %s1074_s1 }
  0x28   : > { %s297_s19 = scalar_lea.vmem (!%p1003_p3), [#allocation3], %s602_s29 }
  0x2a   : > { %882 = dma.done.wait (%p1044_p12), %s294_s20, 64  }
  0x2b   : > { %884 = vsyncadd (%p1044_p12), %s294_s20, 4294967232 }
  0x2c   : > { %886 = dma.done.wait (%p995_p1), [#allocation7], 2304  }
  0x2d   : > { %888 = vsyncadd (%p995_p1), [#allocation7], 4294964992 }
  0x2e   : > { %890 = dma.done.wait (%p995_p1), [#allocation10], 2048  }
  0x2f   : > { %892 = vsyncadd (%p995_p1), [#allocation10], 4294965248  ;;  %v352_v0 = vld [vmem:[#allocation6 + $0x8] sm:$0xff]  ;;  %v351_v1 = vld [vmem:[#allocation6] sm:$0xff]  ;;  %vm353_vm0 = vcmask 130048   ;;  %s606_s13 = sshll.u32 %s1074_s1, 3 }
  0x30   : > { %v349_v2 = vld [vmem:[%s297_s19] sm:$0xf]  ;;  %371 = vmatpush.msra.mxu0 %v352_v0  ;;  %v398_v4 = vld [vmem:[#allocation8 + $0x78] sm:$0xff]  ;;  %v397_v5 = vld [vmem:[#allocation8 + $0x70] sm:$0xff]  ;;  %s609_s11 = sshll.u32 %s911_s24, 3  ;;  %s341_s14 = scalar_lea.vmem [#allocation11], %s606_s13 }
  0x31   : > { %v350_v3 = vunpack.c.l.bf16 %v349_v2  ;;  %403 = vmatpush.msra.mxu1 %v398_v4  ;;  %v396_v6 = vld [vmem:[#allocation8 + $0x68] sm:$0xff]  ;;  %v395_v7 = vld [vmem:[#allocation8 + $0x60] sm:$0xff]  ;;  %v394_v8 = vld [vmem:[#allocation8 + $0x58] sm:$0xff]  ;;  %s477_s7 = scalar_lea.hbm %s1141_s6, %s609_s11  ;;  %s479_s12 = sshll.u32 %s341_s14, 4  ;;  %s480_s12 = int_to_ptr.vmem [resolvable:$true] %s479_s12 }
  0x32   : > { %372 = vmatpush.msra.mxu0 %v351_v1  ;;  %v393_v9 = vld [vmem:[#allocation8 + $0x50] sm:$0xff]  ;;  %v392_v10 = vld [vmem:[#allocation8 + $0x48] sm:$0xff]  ;;  %v391_v11 = vld [vmem:[#allocation8 + $0x40] sm:$0xff]  ;;  %s481_s29 = sshll.u32 %s477_s7, 4  ;;  %s467_s20 = scalar_lea.sflag [#allocation5], %s1074_s1  ;;  %s482_s29 = int_to_ptr.hbm [resolvable:$true] %s481_s29 }
  0x33   : > { %607 = vmatmul.msk.f32.vlgmr.msra.gmra.mxu0 %vm353_vm0, %v350_v3  ;;  %404 = vmatpush.msra.mxu1 %v397_v5  ;;  %v390_v12 = vld [vmem:[#allocation8 + $0x38] sm:$0xff]  ;;  %v389_v13 = vld [vmem:[#allocation8 + $0x30] sm:$0xff]  ;;  %v388_v14 = vld [vmem:[#allocation8 + $0x28] sm:$0xff]  ;;  %s843_s24 = sshra.s32 %s482_s29, 4  ;;  %s849_s11 = scalar_lea.hbm %s1141_s6, 16  ;;  %s844_s24 = int_to_ptr.hbm [resolvable:$true] %s843_s24 }
  0x34   : > { %v387_v15 = vld [vmem:[#allocation8 + $0x20] sm:$0xff]  ;;  %v386_v16 = vld [vmem:[#allocation8 + $0x18] sm:$0xff]  ;;  %v385_v17 = vld [vmem:[#allocation8 + $0x10] sm:$0xff]  ;;  %s845_s19 = scalar_lea.hbm %s844_s24, 8  ;;  %p850_p10 = scmp.lt.s32.totalorder %s844_s24, %s1141_s6 }
  0x35   : > { %405 = vmatpush.msra.mxu1 %v396_v6  ;;  %v384_v18 = vld [vmem:[#allocation8 + $0x8] sm:$0xff]  ;;  %v383_v19 = vld [vmem:[#allocation8] sm:$0xff]  ;;  %v439_v20 = vld [vmem:[#allocation9 + $0x78] sm:$0xff]  ;;  %p846_p1 = scmp.ne.s32.totalorder %s844_s24, %s845_s19  ;;  %p851_p11 = scmp.lt.s32.totalorder %s849_s11, %s845_s19 }
  0x36   : > { %v438_v21 = vld [vmem:[#allocation9 + $0x70] sm:$0xff]  ;;  %444 = vmatpush.msra.mxu2 %v439_v20  ;;  %v437_v22 = vld [vmem:[#allocation9 + $0x68] sm:$0xff]  ;;  %v436_v23 = vld [vmem:[#allocation9 + $0x60] sm:$0xff] }
  0x37   : > { %406 = vmatpush.msra.mxu1 %v395_v7  ;;  %v435_v24 = vld [vmem:[#allocation9 + $0x58] sm:$0xff]  ;;  %v434_v25 = vld [vmem:[#allocation9 + $0x50] sm:$0xff]  ;;  %v433_v26 = vld [vmem:[#allocation9 + $0x48] sm:$0xff]  ;;  %p847_p3 = pnand %p846_p1, %p1052_p4  ;;  %p852_p12 = por %p851_p11, %p850_p10 }
  0x38   : > { %445 = vmatpush.msra.mxu2 %v438_v21  ;;  %v432_v27 = vld [vmem:[#allocation9 + $0x40] sm:$0xff]  ;;  %v431_v28 = vld [vmem:[#allocation9 + $0x38] sm:$0xff]  ;;  %v430_v29 = vld [vmem:[#allocation9 + $0x30] sm:$0xff] }
  0x39   : > { %407 = vmatpush.msra.mxu1 %v394_v8  ;;  %v429_v30 = vld [vmem:[#allocation9 + $0x28] sm:$0xff]  ;;  %v428_v31 = vld [vmem:[#allocation9 + $0x20] sm:$0xff]  ;;  %v427_v32 = vld [vmem:[#allocation9 + $0x18] sm:$0xff]  ;;  %p848_p9 = pneg %p847_p3 }
  0x3a   : > { %446 = vmatpush.msra.mxu2 %v437_v22  ;;  %v426_v34 = vld [vmem:[#allocation9 + $0x10] sm:$0xff]  ;;  %v425_v35 = vld [vmem:[#allocation9 + $0x8] sm:$0xff]  ;;  %v424_v36 = vld [vmem:[#allocation9] sm:$0xff] }
  0x3b   : > { %408 = vmatpush.msra.mxu1 %v393_v9  ;;  %v707_v37 = vld [vmem:[%s1138_s3] ss:$0 sm:$0xff]  ;;  %p853_p13 = pnand %p852_p12, %p848_p9 }
  0x3c   : > { %447 = vmatpush.msra.mxu2 %v436_v23  ;;  %v708_v41 = vld [vmem:[%s1140_s5] ss:$0 sm:$0xff] }
  0x3d   : > { %409 = vmatpush.msra.mxu1 %v392_v10 }
  0x3e   : > { %448 = vmatpush.msra.mxu2 %v435_v24 }
  0x3f   : > { %410 = vmatpush.msra.mxu1 %v391_v11 }
  0x40   : > { %449 = vmatpush.msra.mxu2 %v434_v25 }
  0x41   : > { %411 = vmatpush.msra.mxu1 %v390_v12 }
  0x42   : > { %450 = vmatpush.msra.mxu2 %v433_v26 }
  0x43   : > { %412 = vmatpush.msra.mxu1 %v389_v13 }
  0x44   : > { %451 = vmatpush.msra.mxu2 %v432_v27 }
  0x45   : > { %413 = vmatpush.msra.mxu1 %v388_v14 }
  0x46   : > { %452 = vmatpush.msra.mxu2 %v431_v28 }
  0x47   : > { %414 = vmatpush.msra.mxu1 %v387_v15 }
  0x48   : > { %453 = vmatpush.msra.mxu2 %v430_v29 }
  0x49   : > { %415 = vmatpush.msra.mxu1 %v386_v16 }
  0x4a   : > { %454 = vmatpush.msra.mxu2 %v429_v30 }
  0x4b   : > { %416 = vmatpush.msra.mxu1 %v385_v17 }
  0x4c   : > { %455 = vmatpush.msra.mxu2 %v428_v31 }
  0x4d   : > { %417 = vmatpush.msra.mxu1 %v384_v18 }
  0x4e   : > { %456 = vmatpush.msra.mxu2 %v427_v32 }
  0x4f   : > { %418 = vmatpush.msra.mxu1 %v383_v19 }
  0x50   : > { %457 = vmatpush.msra.mxu2 %v426_v34 }
  0x52   : > { %458 = vmatpush.msra.mxu2 %v425_v35 }
  0x54   : > { %459 = vmatpush.msra.mxu2 %v424_v36 }
  0xb0   : > { %v374_v33 = vpop.f32.mrf.mxu0 }
  0xb1   : > { %419 = vmatmul.f32.vlgmr.msra.gmra.mxu1 %v374_v33 }
 0x12e   : > { %v420_v38 = vpop.f32.mrf.mxu1 }
 0x12f   : > { %v421_v39 = vadd.f32 %v707_v37, %v420_v38 }
 0x131   : > { %v423_v40 = vmax.f32 %v421_v39, 0.0 }
 0x133   : > { %460 = vmatmul.f32.vlgmr.msra.gmra.mxu2 %v423_v40 }
 0x1b6   : > { %v461_v42 = vpop.f32.mrf.mxu2 }
 0x1b7   : > { %v462_v43 = vadd.f32 %v708_v41, %v461_v42 }
 0x1b9   : > { %v464_v44 = vmax.f32 %v462_v43, 0.0 }
 0x1bb   : > { %465 = vst [vmem:[%s341_s14] sm:$0xff] %v464_v44 }
 0x1bc   : > { %856 = shalt.err (!%p853_p13)
}
 0x1bd   : > { %626 = dma.vmem_to_hbm [thread:$0]  (%p1052_p4), %s480_s12, 128, %s482_s29, %s467_s20  }
 0x1be PF: > { %s493_s1 = sand.u32 1, %s899_s21   ;;  %p643_p0 = pnand %p598_p6, %p1060_p7 }
 0x1bf   : > { %s494_s30 = scalar_lea.sflag [#allocation5], %s493_s1 }
 0x1c0   : > { %p644_p2 = pneg %p643_p0 }
 0x1c2   : > { %894 = dma.done.wait (%p644_p2), %s494_s30, 128  }
 0x1c3   : > { %896 = vsyncadd (%p644_p2), %s494_s30, 4294967168  ;;  %s24_s26 = sadd.s32 1, %s919_s26   ;;  %s1151_s21 = smov %s903_s22 }
 0x1c4   : > { %p21_p5 = scmp.ge.s32.totalorder %s24_s26, 4   ;;  %s1152_s22 = smov %s907_s23 }
 0x1c5   : > { %s1153_s23 = smov %s1058_s16  ;;  %s1154_s24 = smov %s915_s25 }
 0x1c6   : > { %s1155_s25 = smov %s1157_s10  ;;  %23 = sbr.rel (!%p21_p5) target bundleno = 10 (0xa), region = 110 }
 0x1cb   :  { %500 = vsyncpa [#allocation4], 1 }
 0x1cc   :  { %502 = vsyncpa [#allocation4 + $0x1], 1 }
 0x1cd   :  { %503 = vsyncpa [#allocation7], 1 }
 0x1ce   :  { %504 = vsyncpa [#allocation10], 1 }
 0x1cf   :  { %505 = vsyncpa [#allocation5], 1 }
 0x1d0   :  { %507 = vsyncpa [#allocation5 + $0x1], 1 }

</bundles_post_ra>
